<compile_context>
chip_gen: v7x
topology: tpu7x:2x2x1
jax: 0.10.0
libtpu: 0.0.40
codegen_flags: <defaults>
</compile_context>

<pallas_src>
import jax
import jax.numpy as jnp
from jax import lax
from jax.experimental import pallas as pl
from jax.experimental.pallas import tpu as pltpu


def _patch_embed_kernel(xp_ref, w_ref, b_ref, o_ref):
    """One grid step = one (M-tile, E-tile) output block.

    xp_ref : (TM, K)   flattened patches (batch and patch axes fused)
    w_ref  : (K, TE)   projection weight, (in, out) layout
    b_ref  : (1, TE)   bias
    o_ref  : (TM, TE)
    """
    acc = jnp.dot(xp_ref[...], w_ref[...], preferred_element_type=jnp.float32)
    o_ref[...] = (acc + b_ref[...].astype(jnp.float32)).astype(o_ref.dtype)


def patch_embed_pallas(x, weight, bias, *, patch_size, tile_m=256, tile_e=256):
    """PatchEmbed forward.

    x      : (B, C, H, W)
    weight : (E, C, ph, pw)   -- nn.Conv2d weight
    bias   : (E,)             -- nn.Conv2d bias
    returns: (B, num_patches, E)
    """
    ph, pw = patch_size
    B, C, H, W = x.shape
    assert H % ph == 0 and W % pw == 0, "image size must be divisible by patch size"
    E = weight.shape[0]
    Hp, Wp = H // ph, W // pw
    Np = Hp * Wp
    K = C * ph * pw
    M = B * Np

    # --- layout plumbing (no FLOPs): im2col for stride==kernel patches ---------
    # (B, C, H, W) -> (B, Hp, Wp, C, ph, pw) -> (M, K); the (C, ph, pw)
    # flattening order matches the Conv2d weight layout (E, C, ph, pw).
    xp = x.reshape(B, C, Hp, ph, Wp, pw).transpose(0, 2, 4, 1, 3, 5)
    xp = xp.reshape(M, K)
    w2d = weight.reshape(E, K).T          # (K, E):  y = patches @ w2d + bias
    b2d = bias.reshape(1, E)

    # --- tile sizes -------------------------------------------------------------
    # Full-extent blocks are always legal; otherwise keep the second-minor dim a
    # multiple of 8 and the lane (minor) dim a multiple of 128. K is never tiled.
    tm = M if M <= tile_m else max((tile_m // 8) * 8, 8)
    te = E if E <= tile_e else max((tile_e // 128) * 128, 128)

    grid = (pl.cdiv(M, tm), pl.cdiv(E, te))   # E innermost: patch block stays resident

    out2d = pl.pallas_call(
        _patch_embed_kernel,
        out_shape=jax.ShapeDtypeStruct((M, E), x.dtype),
        grid_spec=pltpu.PrefetchScalarGridSpec(
            num_scalar_prefetch=0,
            grid=grid,
            in_specs=[
                pl.BlockSpec((tm, K), lambda m, e: (m, 0)),   # patches
                pl.BlockSpec((K, te), lambda m, e: (0, e)),   # weight
                pl.BlockSpec((1, te), lambda m, e: (0, e)),   # bias
            ],
            out_specs=pl.BlockSpec((tm, te), lambda m, e: (m, e)),
        ),
        compiler_params=pltpu.CompilerParams(
            dimension_semantics=("parallel", "parallel"),
        ),
    )(xp, w2d, b2d)

    return out2d.reshape(B, Np, E)


def patch_embed_reference(x, weight, bias, *, patch_size):
    """Pure-JAX reference mirroring the PyTorch forward exactly."""
    ph, pw = patch_size
    y = lax.conv_general_dilated(
        x, weight, window_strides=(ph, pw), padding="VALID",
        dimension_numbers=("NCHW", "OIHW", "NCHW"))
    y = y + bias.reshape(1, -1, 1, 1)
    B, E, Hp, Wp = y.shape
    return y.reshape(B, E, Hp * Wp).transpose(0, 2, 1)


if __name__ == "__main__":
    # Small shapes consistent with the module: 16x16 image, 4x4 patches,
    # 3 input channels, embed_dim=128 -> 16 patches, lane-dense 128-wide output.
    B, C, H, W = 2, 3, 16, 16
    PATCH = (4, 4)
    E = 128

    key = jax.random.PRNGKey(0)
    kx, kw, kb = jax.random.split(key, 3)
    x = jax.random.normal(kx, (B, C, H, W), dtype=jnp.float32)
    weight = jax.random.normal(kw, (E, C, PATCH[0], PATCH[1]), dtype=jnp.float32) * 0.05
    bias = jax.random.normal(kb, (E,), dtype=jnp.float32) * 0.01

    out = patch_embed_pallas(x, weight, bias, patch_size=PATCH)
    out = jax.block_until_ready(out)

    ref = patch_embed_reference(x, weight, bias, patch_size=PATCH)
    num_patches = (H // PATCH[0]) * (W // PATCH[1])
    assert out.shape == (B, num_patches, E), out.shape
    assert jnp.allclose(out, ref, atol=1e-4, rtol=1e-4), "mismatch vs reference"

    print("KERNEL_OK")
</pallas_src>

<mosaic_0001>
module attributes {stable_mosaic.version = 11 : i64} {
  func.func @_patch_embed_kernel(%arg0: i32, %arg1: i32, %arg2: memref<32x48xf32, #tpu.memory_space<vmem>>, %arg3: memref<48x128xf32, #tpu.memory_space<vmem>>, %arg4: memref<1x128xf32, #tpu.memory_space<vmem>>, %arg5: memref<32x128xf32, #tpu.memory_space<vmem>>) attributes {dimension_semantics = [#tpu.dimension_semantics<parallel>, #tpu.dimension_semantics<parallel>], iteration_bounds = array<i64: 1, 1>, scalar_prefetch = 0 : i64, scratch_operands = 0 : i64, tpu.core_type = #tpu.core_type<tc>, window_params = [{transform_indices = @transform_0, window_bounds = array<i64: 32, 48>}, {transform_indices = @transform_1, window_bounds = array<i64: 48, 128>}, {transform_indices = @transform_2, window_bounds = array<i64: 1, 128>}, {transform_indices = @transform_3, window_bounds = array<i64: 32, 128>}]} {
    %c0 = arith.constant 0 : index
    %c0_0 = arith.constant 0 : index
    %0 = vector.load %arg2[%c0, %c0_0] : memref<32x48xf32, #tpu.memory_space<vmem>>, vector<32x48xf32>
    %c0_1 = arith.constant 0 : index
    %c0_2 = arith.constant 0 : index
    %1 = vector.load %arg3[%c0_1, %c0_2] : memref<48x128xf32, #tpu.memory_space<vmem>>, vector<48x128xf32>
    %cst = arith.constant dense<0.000000e+00> : vector<32x128xf32>
    %2 = tpu.matmul %0, %1, %cst {dimension_numbers = #tpu.dot_dimension_numbers<[1], [0], [0], [1], [0, 0, 1, 1], [], []>} : vector<32x48xf32>, vector<48x128xf32>, vector<32x128xf32> -> vector<32x128xf32>
    %c0_3 = arith.constant 0 : index
    %c0_4 = arith.constant 0 : index
    %3 = vector.load %arg4[%c0_3, %c0_4] : memref<1x128xf32, #tpu.memory_space<vmem>>, vector<1x128xf32>
    %4 = vector.broadcast %3 : vector<1x128xf32> to vector<32x128xf32>
    %5 = arith.addf %2, %4 : vector<32x128xf32>
    %c0_5 = arith.constant 0 : index
    %c0_6 = arith.constant 0 : index
    %6 = vector.load %arg5[%c0_5, %c0_6] : memref<32x128xf32, #tpu.memory_space<vmem>>, vector<32x128xf32>
    tpu.vector_store %arg5[%c0_5, %c0_6], %5 {strides = array<i32>} : memref<32x128xf32, #tpu.memory_space<vmem>>, vector<32x128xf32>,
    return
  }
  func.func @transform_0(%arg0: i32, %arg1: i32) -> (i32, i32) {
    %c0_i32 = arith.constant 0 : i32
    %c0_i32_0 = arith.constant 0 : i32
    return %arg0, %c0_i32 : i32, i32
  }
  func.func @transform_1(%arg0: i32, %arg1: i32) -> (i32, i32) {
    %c0_i32 = arith.constant 0 : i32
    %c0_i32_0 = arith.constant 0 : i32
    return %c0_i32, %arg1 : i32, i32
  }
  func.func @transform_2(%arg0: i32, %arg1: i32) -> (i32, i32) {
    %c0_i32 = arith.constant 0 : i32
    %c0_i32_0 = arith.constant 0 : i32
    return %c0_i32, %arg1 : i32, i32
  }
  func.func @transform_3(%arg0: i32, %arg1: i32) -> (i32, i32) {
    %c0_i32 = arith.constant 0 : i32
    return %arg0, %arg1 : i32, i32
  }
}

</mosaic_0001>

<bundles_post_ra>
// kernel: tpu_custom_call.1
= control target key start
LH: loop header
LB: loop body
LE: loop exit
PB: predicated region body
PF: predicated region fallthrough
CT: control target
= control target key end

     0   :  { %8 = vsyncpa [#allocation3], 0  ;;  %s385_s0 = inlined_call_operand.hbm [shape: f32[32,48], index: 0, kind: input, shape index: {}]   ;;  %s386_s1 = inlined_call_operand.hbm [shape: f32[48,128], index: 1, kind: input, shape index: {}]   ;;  %s387_s2 = inlined_call_operand.vmem [shape: f32[1,128], index: 2, kind: input, shape index: {}]   ;;  %s388_s3 = inlined_call_operand.hbm [shape: f32[32,128], index: 3, kind: output, shape index: {}]  }
   0x1   :  { %9 = vsyncpa [#allocation6], 0 }
   0x2   :  { %10 = vsyncpa [#allocation4], 0  ;;  %s308_s12 = smov [#allocation2]   ;;  %s236_s16 = scalar_lea.hbm %s385_s0, 512 }
   0x3   :  { %s16_s13 = sshll.u32 %s308_s12, 4  ;;  %p237_p0 = scmp.ne.s32.totalorder %s385_s0, %s236_s16  ;;  %s17_s13 = int_to_ptr.vmem [resolvable:$true] %s16_s13 }
   0x4   :  { %p240_p1 = scmp.lt.u32.totalorder %s236_s16, %s385_s0 }
   0x6   :  { %p242_p2 = pnand %p240_p1, %p237_p0 }
   0x8   :  { %245 = shalt.err (!%p242_p2)
}
   0x9   :  { %s246_s21 = scalar_lea.vmem %s17_s13, 512  ;;  %p251_p4 = scmp.lt.s32.totalorder %s17_s13, %s17_s13 }
   0xa   :  { %p247_p3 = scmp.ne.s32.totalorder %s17_s13, %s246_s21  ;;  %p252_p5 = scmp.lt.s32.totalorder %s246_s21, %s246_s21 }
   0xc   :  { %p253_p6 = por %p252_p5, %p251_p4 }
   0xe   :  { %p254_p7 = pnand %p253_p6, %p247_p3 }
  0x10   :  { %257 = shalt.err (!%p254_p7)
}
  0x11   :  { %s309_s22 = smov 128   ;;  %s310_s23 = smov 8  }
  0x12   :  { %22 = dma.hbm_to_vmem [thread:$0]  %s385_s0, 512, %s17_s13, [#allocation3], %s309_s22, %s309_s22, %s310_s23  }
  0x13   :  { %s311_s26 = smov [#allocation5]   ;;  %s258_s30 = scalar_lea.hbm %s386_s1, 768 }
  0x14   :  { %s28_s27 = sshll.u32 %s311_s26, 4  ;;  %p259_p8 = scmp.ne.s32.totalorder %s386_s1, %s258_s30  ;;  %s29_s27 = int_to_ptr.vmem [resolvable:$true] %s28_s27 }
  0x15   :  { %p262_p9 = scmp.lt.u32.totalorder %s258_s30, %s386_s1 }
  0x17   :  { %p264_p10 = pnand %p262_p9, %p259_p8 }
  0x19   :  { %267 = shalt.err (!%p264_p10)
}
  0x1a   :  { %s268_s8 = scalar_lea.vmem %s29_s27, 768  ;;  %p273_p12 = scmp.lt.s32.totalorder %s29_s27, %s29_s27 }
  0x1b   :  { %p269_p11 = scmp.ne.s32.totalorder %s29_s27, %s268_s8  ;;  %p274_p13 = scmp.lt.s32.totalorder %s268_s8, %s268_s8 }
  0x1d   :  { %p275_p0 = por %p274_p13, %p273_p12 }
  0x1f   :  { %p276_p1 = pnand %p275_p0, %p269_p11 }
  0x21   :  { %279 = shalt.err (!%p276_p1)
}
  0x22   :  { %34 = dma.hbm_to_vmem [thread:$0]  %s386_s1, 768, %s29_s27, [#allocation6], %s309_s22, %s309_s22, %s310_s23  }
  0x23   :  { %302 = dma.done.wait [#allocation3], 512  }
  0x24   :  { %303 = vsyncadd [#allocation3], 4294966784 }
  0x25   :  { %304 = dma.done.wait [#allocation6], 768  }
  0x26   :  { %305 = vsyncadd [#allocation6], 4294966528  ;;  %v47_v0 = vld [vmem:[#allocation5] sm:$0xff]  ;;  %v48_v1 = vld [vmem:[#allocation5 + $0x8] sm:$0xff]  ;;  %vm60_vm0 = vcmask 392192   ;;  %s312_s11 = smov [#allocation7]  }
  0x27   :  { %v49_v2 = vld [vmem:[#allocation5 + $0x10] sm:$0xff]  ;;  %v213_v3 = vpack.c.bf16 %v48_v1, %v47_v0  ;;  %v50_v4 = vld [vmem:[#allocation5 + $0x18] sm:$0xff]  ;;  %v51_v6 = vld [vmem:[#allocation5 + $0x20] sm:$0xff]  ;;  %s167_s12 = sshll.u32 %s312_s11, 4  ;;  %s168_s12 = int_to_ptr.vmem [resolvable:$true] %s167_s12 }
  0x28   :  { %v217_v5 = vpack.c.bf16 %v50_v4, %v49_v2  ;;  %v52_v7 = vld [vmem:[#allocation5 + $0x28] sm:$0xff]  ;;  %v43_v8 = vld [vmem:[#allocation2] sm:$0xff]  ;;  %v45_v9 = vld [vmem:[#allocation2 + $0x10] sm:$0xff]  ;;  %s280_s13 = scalar_lea.vmem %s168_s12, 512  ;;  %p285_p3 = scmp.lt.s32.totalorder %s168_s12, %s168_s12 }
  0x29   :  { %214 = vmatprep.subr.bf16.mxu0 %v213_v3  ;;  %225 = vmatprep.subr.bf16.mxu1 %v213_v3  ;;  %v221_v10 = vpack.c.bf16 %v52_v7, %v51_v6  ;;  %v44_v11 = vld [vmem:[#allocation2 + $0x8] sm:$0xff]  ;;  %v46_v12 = vld [vmem:[#allocation2 + $0x18] sm:$0xff]  ;;  %v180_v13 = vld [vmem:[%s387_s2] ss:$0 sm:$0xff]  ;;  %p281_p2 = scmp.ne.s32.totalorder %s168_s12, %s280_s13  ;;  %p286_p4 = scmp.lt.s32.totalorder %s280_s13, %s280_s13 }
  0x2a   :  { %216 = vmatpush3.bf16.msra.mxu0 %v213_v3  ;;  %228 = vmatpush3.bf16.msra.mxu1 %v213_v3 }
  0x2b   :  { %218 = vmatprep.subr.bf16.mxu0 %v217_v5  ;;  %226 = vmatprep.subr.bf16.mxu1 %v217_v5  ;;  %p287_p5 = por %p286_p4, %p285_p3 }
  0x2c   :  { %207 = vmatprep.mubr.msk.f32.mxu0 %vm60_vm0, %v43_v8  ;;  %210 = vmatprep.mubr.msk.f32.mxu1 %vm60_vm0, %v45_v9 }
  0x2d   :  { %p288_p6 = pnand %p287_p5, %p281_p2 }
  0x2e   :  { %220 = vmatpush3.bf16.msra.mxu0 %v217_v5  ;;  %229 = vmatpush3.bf16.msra.mxu1 %v217_v5 }
  0x2f   :  { %222 = vmatprep.subr.bf16.mxu0 %v221_v10  ;;  %227 = vmatprep.subr.bf16.mxu1 %v221_v10 }
  0x32   :  { %224 = vmatpush3.bf16.msra.mxu0 %v221_v10  ;;  %230 = vmatpush3.bf16.msra.mxu1 %v221_v10 }
  0x35   :  { %208 = vmatmul.mubr.msk.f32.vlgmr.msra.gmra.mrb[0].mxu0 %vm60_vm0, %v44_v11  ;;  %211 = vmatmul.mubr.msk.f32.vlgmr.msra.gmra.mrb[0].mxu1 %vm60_vm0, %v46_v12 }
 0x108   :  { %v209_v14 = vpop.f32.mrb[0].mxu0  ;;  %v212_v15 = vpop.f32.mrb[0].mxu1 }
 0x109   :  { %v145_v16 = vadd.f32 %v209_v14, %v180_v13  ;;  %v155_v17 = vadd.f32 %v212_v15, %v180_v13  ;;  %v139_v18 = vpop.f32.mrb[1].mxu0  ;;  %v149_v19 = vpop.f32.mrb[1].mxu1 }
 0x10a   :  { %v140_v20 = vadd.f32 %v180_v13, %v139_v18  ;;  %v150_v21 = vadd.f32 %v180_v13, %v149_v19 }
 0x10b   :  { %159 = vst [vmem:[#allocation7 + $0x8] sm:$0xff] %v145_v16  ;;  %161 = vst [vmem:[#allocation7 + $0x18] sm:$0xff] %v155_v17 }
 0x10c   :  { %158 = vst [vmem:[#allocation7] sm:$0xff] %v140_v20  ;;  %160 = vst [vmem:[#allocation7 + $0x10] sm:$0xff] %v150_v21 }
 0x10d   :  { %291 = shalt.err (!%p288_p6)
}
 0x10e   :  { %s292_s15 = scalar_lea.hbm %s388_s3, 512 }
 0x10f   :  { %p293_p7 = scmp.ne.s32.totalorder %s388_s3, %s292_s15  ;;  %p296_p8 = scmp.lt.u32.totalorder %s292_s15, %s388_s3 }
 0x111   :  { %p298_p9 = pnand %p296_p8, %p293_p7 }
 0x113   :  { %301 = shalt.err (!%p298_p9)
}
 0x114   :  { %173 = dma.vmem_to_hbm [thread:$0]  %s168_s12, 512, %s388_s3, [#allocation4], %s309_s22, %s309_s22, %s310_s23  }
 0x115   :  { %306 = dma.done.wait [#allocation4], 512  }
 0x116   :  { %307 = vsyncadd [#allocation4], 4294966784 }
 0x117   :  { %177 = vsyncpa [#allocation3], 1 }
 0x118   :  { %178 = vsyncpa [#allocation6], 1 }
 0x119   :  { %179 = vsyncpa [#allocation4], 1 }

</bundles_post_ra>
